<compile_context>
chip_gen: v5e
topology: v5e:2x2
jax: 0.10.0
libtpu: 0.0.40
codegen_flags: <defaults>
</compile_context>

<pallas_src>
import jax
import jax.numpy as jnp
from jax.experimental import pallas as pl
from jax.experimental.pallas import tpu as pltpu

LANE = 128


def _round_up(x, m):
    return (x + m - 1) // m * m


def mlp_readout_kernel(x_ref, w0_ref, b0_ref, w1_ref, b1_ref, w2_ref, b2_ref,
                       o_ref):
    # In-kernel cast: x block arrives as f32 straight from HBM, MXU operands
    # are bf16, accumulation / bias / ReLU stay f32.
    x = x_ref[...].astype(w0_ref.dtype)                      # (TILE_N, D_in) bf16

    # Layer 0: Linear + ReLU
    h = jnp.dot(x, w0_ref[...], preferred_element_type=jnp.float32)
    h = jnp.maximum(h + b0_ref[...], 0.0)

    # Layer 1: Linear + ReLU
    h = jnp.dot(h.astype(w1_ref.dtype), w1_ref[...],
                preferred_element_type=jnp.float32)
    h = jnp.maximum(h + b1_ref[...], 0.0)

    # Layer 2 (final): Linear, no activation. Matmul is lane-dense (out_p=128
    # columns); only the real out_dim lanes are biased and stored.
    y = jnp.dot(h.astype(w2_ref.dtype), w2_ref[...],
                preferred_element_type=jnp.float32)
    out_dim = o_ref.shape[-1]
    o_ref[...] = (y[:, :out_dim] + b2_ref[...]).astype(o_ref.dtype)


def prepare_mlp_readout_params(params, compute_dtype=jnp.bfloat16):
    """One-time weight prep: pad output-feature axes to 128 lanes and cast
    weights to the MXU dtype. Zero padding is exact (relu(0)=0, zero weight
    rows contribute nothing). Cache the result across calls."""
    w0, b0 = params["w0"], params["b0"]
    w1, b1 = params["w1"], params["b1"]
    w2, b2 = params["w2"], params["b2"]

    d_in, h0 = w0.shape
    h1, out_dim = w1.shape[1], w2.shape[1]
    h0_p, h1_p, out_p = (_round_up(d, LANE) for d in (h0, h1, out_dim))

    def pad2(a, rows, cols):
        return jnp.pad(a, ((0, rows - a.shape[0]), (0, cols - a.shape[1])))

    return dict(
        w0=pad2(w0, d_in, h0_p).astype(compute_dtype),
        w1=pad2(w1, h0_p, h1_p).astype(compute_dtype),
        w2=pad2(w2, h1_p, out_p).astype(compute_dtype),
        b0=pad2(b0, 1, h0_p).astype(jnp.float32),
        b1=pad2(b1, 1, h1_p).astype(jnp.float32),
        b2=b2.astype(jnp.float32),            # unpadded: (1, out_dim)
        out_dim=out_dim,
    )


def mlp_readout(x, prepared, *, tile_n=None, max_tile_n=2048):
    """x: [N, D_in] float32. prepared: output of prepare_mlp_readout_params."""
    w0p, b0p = prepared["w0"], prepared["b0"]
    w1p, b1p = prepared["w1"], prepared["b1"]
    w2p, b2p = prepared["w2"], prepared["b2"]
    out_dim = prepared["out_dim"]

    n, d_in = x.shape
    assert w0p.shape[0] == d_in, (w0p.shape, d_in)

    # Row tiling: aim for a 2-step grid (tiny per-step overhead, still an even
    # grid for v7x's 2 TCs); tile_n forced to a multiple of 8 (f32 sublanes).
    if tile_n is None:
        tile_n = min(max_tile_n, pl.cdiv(n, 2))
    tile_n = _round_up(max(tile_n, 8), 8)
    n_pad = _round_up(n, tile_n)
    xp = x if n_pad == n else jnp.pad(x, ((0, n_pad - n), (0, 0)))
    grid = (n_pad // tile_n,)

    # VMEM budget from the actual working set (weights + x/out tiles, each
    # double-buffered by default), with 2x headroom, clamped well under v7x's
    # 64 MiB physical VMEM.
    weight_bytes = sum(int(a.size) * a.dtype.itemsize
                       for a in (w0p, b0p, w1p, b1p, w2p, b2p))
    tile_bytes = tile_n * (d_in + out_dim) * 4          # f32 x-tile + out-tile
    vmem_need = 2 * (weight_bytes + tile_bytes)
    vmem_limit = int(min(max(2 * vmem_need, 4 << 20), 48 << 20))

    h0_p, h1_p, out_p = w0p.shape[1], w1p.shape[1], w2p.shape[1]
    cost = pl.CostEstimate(
        flops=2 * n * (d_in * h0_p + h0_p * h1_p + h1_p * out_p),
        transcendentals=0,
        bytes_accessed=n * d_in * 4 + weight_bytes + n * out_dim * 4,
    )

    # Weights/biases: constant index_map -> DMA'd once, resident in VMEM.
    const = lambda a: pl.BlockSpec(a.shape, lambda i: (0, 0))

    out = pl.pallas_call(
        mlp_readout_kernel,
        out_shape=jax.ShapeDtypeStruct((n_pad, out_dim), jnp.float32),
        grid_spec=pltpu.PrefetchScalarGridSpec(
            num_scalar_prefetch=0,
            grid=grid,
            in_specs=[pl.BlockSpec((tile_n, d_in), lambda i: (i, 0)),
                      const(w0p), const(b0p),
                      const(w1p), const(b1p),
                      const(w2p), const(b2p)],
            out_specs=pl.BlockSpec((tile_n, out_dim), lambda i: (i, 0)),
        ),
        compiler_params=pltpu.CompilerParams(
            dimension_semantics=("parallel",),
            vmem_limit_bytes=vmem_limit),
        cost_estimate=cost,
    )(xp, w0p, b0p, w1p, b1p, w2p, b2p)

    return out if n_pad == n else out[:n]


def init_mlp_readout_params(key, input_dim, output_dim, L=2):
    """Synthetic init matching nn.Linear shapes (weights stored transposed)."""
    dims = [input_dim // (2 ** l) for l in range(L + 1)] + [output_dim]
    params = {}
    for l in range(L + 1):
        fan_in, fan_out = dims[l], dims[l + 1]
        key, kw, kb = jax.random.split(key, 3)
        bound = 1.0 / jnp.sqrt(fan_in)
        params[f"w{l}"] = jax.random.uniform(
            kw, (fan_in, fan_out), jnp.float32, -bound, bound)
        params[f"b{l}"] = jax.random.uniform(
            kb, (1, fan_out), jnp.float32, -bound, bound)
    return params


def mlp_readout_ref(x, params, L=2, compute_dtype=jnp.float32):
    """Pure-JAX reference; compute_dtype mirrors the kernel's operand cast."""
    y = x
    for l in range(L + 1):
        w = params[f"w{l}"].astype(compute_dtype)
        y = jnp.dot(y.astype(compute_dtype), w,
                    preferred_element_type=jnp.float32)
        y = y + params[f"b{l}"]
        if l < L:
            y = jnp.maximum(y, 0.0)
    return y


if __name__ == "__main__":
    INPUT_DIM = 32    # -> hidden dims 16, 8
    OUTPUT_DIM = 8
    BATCH = 64
    L = 2

    key = jax.random.PRNGKey(0)
    key, kx = jax.random.split(key)
    x = jax.random.normal(kx, (BATCH, INPUT_DIM), jnp.float32)
    params = init_mlp_readout_params(key, INPUT_DIM, OUTPUT_DIM, L=L)

    # One-time weight prep (hoisted out of the per-call path).
    prepared = prepare_mlp_readout_params(params)

    out = jax.block_until_ready(mlp_readout(x, prepared))

    assert out.shape == (BATCH, OUTPUT_DIM), out.shape
    # Tight check vs a reference that mirrors the bf16 operand cast.
    ref_bf16 = mlp_readout_ref(x, params, L=L, compute_dtype=jnp.bfloat16)
    assert jnp.allclose(out, ref_bf16, atol=2e-3, rtol=2e-3), "mismatch (bf16 ref)"
    # Loose check vs the full-f32 reference (bf16 operand rounding only).
    ref_f32 = mlp_readout_ref(x, params, L=L, compute_dtype=jnp.float32)
    assert jnp.allclose(out, ref_f32, atol=1e-1, rtol=5e-2), "mismatch (f32 ref)"

    print("KERNEL_OK")
</pallas_src>

<mosaic_0001>
module attributes {stable_mosaic.version = 11 : i64} {
  func.func @mlp_readout_kernel(%arg0: i32, %arg1: memref<32x32xf32, #tpu.memory_space<vmem>>, %arg2: memref<32x128xbf16, #tpu.memory_space<vmem>>, %arg3: memref<1x128xf32, #tpu.memory_space<vmem>>, %arg4: memref<128x128xbf16, #tpu.memory_space<vmem>>, %arg5: memref<1x128xf32, #tpu.memory_space<vmem>>, %arg6: memref<128x128xbf16, #tpu.memory_space<vmem>>, %arg7: memref<1x8xf32, #tpu.memory_space<vmem>>, %arg8: memref<32x8xf32, #tpu.memory_space<vmem>>) attributes {dimension_semantics = [#tpu.dimension_semantics<parallel>], iteration_bounds = array<i64: 2>, scalar_prefetch = 0 : i64, scratch_operands = 0 : i64, tpu.core_type = #tpu.core_type<tc>, window_params = [{transform_indices = @transform_0, window_bounds = array<i64: 32, 32>}, {pipeline_mode = #tpu.pipeline_mode<synchronous>, transform_indices = @transform_1, window_bounds = array<i64: 32, 128>}, {pipeline_mode = #tpu.pipeline_mode<synchronous>, transform_indices = @transform_2, window_bounds = array<i64: 1, 128>}, {pipeline_mode = #tpu.pipeline_mode<synchronous>, transform_indices = @transform_3, window_bounds = array<i64: 128, 128>}, {pipeline_mode = #tpu.pipeline_mode<synchronous>, transform_indices = @transform_4, window_bounds = array<i64: 1, 128>}, {pipeline_mode = #tpu.pipeline_mode<synchronous>, transform_indices = @transform_5, window_bounds = array<i64: 128, 128>}, {pipeline_mode = #tpu.pipeline_mode<synchronous>, transform_indices = @transform_6, window_bounds = array<i64: 1, 8>}, {transform_indices = @transform_7, window_bounds = array<i64: 32, 8>}]} {
    %c0 = arith.constant 0 : index
    %c0_0 = arith.constant 0 : index
    %0 = vector.load %arg1[%c0, %c0_0] : memref<32x32xf32, #tpu.memory_space<vmem>>, vector<32x32xf32>
    %1 = arith.truncf %0 : vector<32x32xf32> to vector<32x32xbf16>
    %c0_1 = arith.constant 0 : index
    %c0_2 = arith.constant 0 : index
    %2 = vector.load %arg2[%c0_1, %c0_2] : memref<32x128xbf16, #tpu.memory_space<vmem>>, vector<32x128xbf16>
    %cst = arith.constant dense<0.000000e+00> : vector<32x128xf32>
    %3 = tpu.matmul %1, %2, %cst {dimension_numbers = #tpu.dot_dimension_numbers<[1], [0], [0], [1], [0, 0, 1, 1], [], []>} : vector<32x32xbf16>, vector<32x128xbf16>, vector<32x128xf32> -> vector<32x128xf32>
    %c0_3 = arith.constant 0 : index
    %c0_4 = arith.constant 0 : index
    %4 = vector.load %arg3[%c0_3, %c0_4] : memref<1x128xf32, #tpu.memory_space<vmem>>, vector<1x128xf32>
    %5 = vector.broadcast %4 : vector<1x128xf32> to vector<32x128xf32>
    %6 = arith.addf %3, %5 : vector<32x128xf32>
    %cst_5 = arith.constant 0.000000e+00 : f32
    %7 = vector.broadcast %cst_5 : f32 to vector<32x128xf32>
    %8 = arith.maximumf %6, %7 : vector<32x128xf32>
    %9 = arith.truncf %8 : vector<32x128xf32> to vector<32x128xbf16>
    %c0_6 = arith.constant 0 : index
    %c0_7 = arith.constant 0 : index
    %10 = vector.load %arg4[%c0_6, %c0_7] : memref<128x128xbf16, #tpu.memory_space<vmem>>, vector<128x128xbf16>
    %cst_8 = arith.constant dense<0.000000e+00> : vector<32x128xf32>
    %11 = tpu.matmul %9, %10, %cst_8 {dimension_numbers = #tpu.dot_dimension_numbers<[1], [0], [0], [1], [0, 0, 1, 1], [], []>} : vector<32x128xbf16>, vector<128x128xbf16>, vector<32x128xf32> -> vector<32x128xf32>
    %c0_9 = arith.constant 0 : index
    %c0_10 = arith.constant 0 : index
    %12 = vector.load %arg5[%c0_9, %c0_10] : memref<1x128xf32, #tpu.memory_space<vmem>>, vector<1x128xf32>
    %13 = vector.broadcast %12 : vector<1x128xf32> to vector<32x128xf32>
    %14 = arith.addf %11, %13 : vector<32x128xf32>
    %cst_11 = arith.constant 0.000000e+00 : f32
    %15 = vector.broadcast %cst_11 : f32 to vector<32x128xf32>
    %16 = arith.maximumf %14, %15 : vector<32x128xf32>
    %17 = arith.truncf %16 : vector<32x128xf32> to vector<32x128xbf16>
    %c0_12 = arith.constant 0 : index
    %c0_13 = arith.constant 0 : index
    %18 = vector.load %arg6[%c0_12, %c0_13] : memref<128x128xbf16, #tpu.memory_space<vmem>>, vector<128x128xbf16>
    %cst_14 = arith.constant dense<0.000000e+00> : vector<32x128xf32>
    %19 = tpu.matmul %17, %18, %cst_14 {dimension_numbers = #tpu.dot_dimension_numbers<[1], [0], [0], [1], [0, 0, 1, 1], [], []>} : vector<32x128xbf16>, vector<128x128xbf16>, vector<32x128xf32> -> vector<32x128xf32>
    %20 = vector.extract_strided_slice %19 {offsets = [0, 0], sizes = [32, 8], strides = [1, 1]} : vector<32x128xf32> to vector<32x8xf32>
    %c0_15 = arith.constant 0 : index
    %c0_16 = arith.constant 0 : index
    %21 = vector.load %arg7[%c0_15, %c0_16] : memref<1x8xf32, #tpu.memory_space<vmem>>, vector<1x8xf32>
    %22 = vector.broadcast %21 : vector<1x8xf32> to vector<32x8xf32>
    %23 = arith.addf %20, %22 : vector<32x8xf32>
    %c0_17 = arith.constant 0 : index
    %c0_18 = arith.constant 0 : index
    %24 = vector.load %arg8[%c0_17, %c0_18] : memref<32x8xf32, #tpu.memory_space<vmem>>, vector<32x8xf32>
    tpu.vector_store %arg8[%c0_17, %c0_18], %23 {strides = array<i32>} : memref<32x8xf32, #tpu.memory_space<vmem>>, vector<32x8xf32>,
    return
  }
  func.func @transform_0(%arg0: i32) -> (i32, i32) {
    %c0_i32 = arith.constant 0 : i32
    %c0_i32_0 = arith.constant 0 : i32
    return %arg0, %c0_i32 : i32, i32
  }
  func.func @transform_1(%arg0: i32) -> (i32, i32) {
    %c0_i32 = arith.constant 0 : i32
    %c0_i32_0 = arith.constant 0 : i32
    %c0_i32_1 = arith.constant 0 : i32
    return %c0_i32, %c0_i32_0 : i32, i32
  }
  func.func @transform_2(%arg0: i32) -> (i32, i32) {
    %c0_i32 = arith.constant 0 : i32
    %c0_i32_0 = arith.constant 0 : i32
    %c0_i32_1 = arith.constant 0 : i32
    return %c0_i32, %c0_i32_0 : i32, i32
  }
  func.func @transform_3(%arg0: i32) -> (i32, i32) {
    %c0_i32 = arith.constant 0 : i32
    %c0_i32_0 = arith.constant 0 : i32
    %c0_i32_1 = arith.constant 0 : i32
    return %c0_i32, %c0_i32_0 : i32, i32
  }
  func.func @transform_4(%arg0: i32) -> (i32, i32) {
    %c0_i32 = arith.constant 0 : i32
    %c0_i32_0 = arith.constant 0 : i32
    %c0_i32_1 = arith.constant 0 : i32
    return %c0_i32, %c0_i32_0 : i32, i32
  }
  func.func @transform_5(%arg0: i32) -> (i32, i32) {
    %c0_i32 = arith.constant 0 : i32
    %c0_i32_0 = arith.constant 0 : i32
    %c0_i32_1 = arith.constant 0 : i32
    return %c0_i32, %c0_i32_0 : i32, i32
  }
  func.func @transform_6(%arg0: i32) -> (i32, i32) {
    %c0_i32 = arith.constant 0 : i32
    %c0_i32_0 = arith.constant 0 : i32
    %c0_i32_1 = arith.constant 0 : i32
    return %c0_i32, %c0_i32_0 : i32, i32
  }
  func.func @transform_7(%arg0: i32) -> (i32, i32) {
    %c0_i32 = arith.constant 0 : i32
    %c0_i32_0 = arith.constant 0 : i32
    return %arg0, %c0_i32 : i32, i32
  }
}

</mosaic_0001>

<bundles_post_ra>
// kernel: tpu_custom_call.1
= control target key start
LH: loop header
LB: loop body
LE: loop exit
PB: predicated region body
PF: predicated region fallthrough
CT: control target
= control target key end

     0   :  { %12 = vsyncpa [#allocation3], 0  ;;  %s845_s24 = smov 0   ;;  %s911_s0 = inlined_call_operand.vmem [shape: f32[64,32], index: 0, kind: input, shape index: {}]   ;;  %s912_s1 = inlined_call_operand.vmem [shape: bf16[32,128], index: 1, kind: input, shape index: {}]   ;;  %s913_s2 = inlined_call_operand.vmem [shape: f32[1,128], index: 2, kind: input, shape index: {}]   ;;  %s914_s3 = inlined_call_operand.vmem [shape: bf16[128,128], index: 3, kind: input, shape index: {}]   ;;  %s915_s4 = inlined_call_operand.vmem [shape: f32[1,128], index: 4, kind: input, shape index: {}]   ;;  %s916_s5 = inlined_call_operand.hbm [shape: bf16[128,128], index: 5, kind: input, shape index: {}]   ;;  %s917_s6 = inlined_call_operand.vmem [shape: f32[1,8], index: 6, kind: input, shape index: {}]   ;;  %s918_s7 = inlined_call_operand.vmem [shape: f32[64,8], index: 7, kind: output, shape index: {}]  }
   0x1 LB: > { %s224_s27 = sshll.u32 %s916_s5, 4  ;;  %s615_s28 = sadd.s32 4294967295, %s800_s24   ;;  %s800_s24 = sphi %s845_s24, %s18_s24   ;;  %s225_s27 = int_to_ptr.hbm [resolvable:$true] %s224_s27 }
   0x2   : > { %p617_p0 = scmp.ge.s32.totalorder %s800_s24, 1  ;;  %p201_p1 = scmp.lt.s32.totalorder %s800_s24, 3 }
   0x3   : > { %p744_p2 = scmp.eq.s32.totalorder %s615_s28, 0  ;;  %s802_s29 = smov [#allocation2]  }
   0x4   : > { %p202_p3 = pnand %p617_p0, %p201_p1  ;;  %s226_s30 = sshll.u32 %s802_s29, 4  ;;  %s227_s30 = int_to_ptr.vmem [resolvable:$true] %s226_s30 }
   0x5   : > { %s803_s8 = smov 64   ;;  %s804_s9 = smov 4  }
   0x6   : > { %p740_p4 = pneg %p202_p3  ;;  %254 = sbr.rel (%p202_p3) target bundleno = 466 (0x1d2), region = 48 }
   0x8   : > { %p741_p5 = pnand %p744_p2, %p740_p4 }
   0xa   : > { %743 = dma.hbm_to_vmem [thread:$0]  (!%p741_p5), %s225_s27, 1024, %s227_s30, [#allocation3], %s803_s8, %s803_s8, %s804_s9  }
   0xb   : > { %795 = dma.done.wait (%p744_p2), [#allocation3], 1024  }
   0xc   : > { %797 = vsyncadd (%p744_p2), [#allocation3], 4294966272  ;;  %s622_s10 = sshll.u32 %s615_s28, 2  ;;  %v703_v0 = vld [vmem:[%s912_s1 + $0x8] sm:$0xff]  ;;  %v702_v1 = vld [vmem:[%s912_s1] sm:$0xff]  ;;  %vm326_vm0 = vcmask 261120  }
   0xd   : > { %p288_p6 = scmp.lt.s32.totalorder %s622_s10, 7  ;;  %339 = vmatpush.bf16.msra.mxu0 %v703_v0  ;;  %v711_v4 = vld [vmem:[%s914_s3 + $0x38] sm:$0xff]  ;;  %v710_v5 = vld [vmem:[%s914_s3 + $0x30] sm:$0xff]  ;;  %v709_v7 = vld [vmem:[%s914_s3 + $0x28] sm:$0xff]  ;;  %vm542_vm1 = vcmask 64512  }
   0xe   : > { %426 = vmatpush.bf16.msra.mxu1 %v711_v4  ;;  %720 = vmatpush.bf16.msra.mxu3 %v711_v4  ;;  %v708_v8 = vld [vmem:[%s914_s3 + $0x20] sm:$0xff]  ;;  %v707_v12 = vld [vmem:[%s914_s3 + $0x18] sm:$0xff]  ;;  %v706_v13 = vld [vmem:[%s914_s3 + $0x10] sm:$0xff] }
   0xf   : > { %s920_s10 = smov (!%p288_p6, %s622_s10), 7  ;;  %v705_v14 = vld [vmem:[%s914_s3 + $0x8] sm:$0xff]  ;;  %v704_v15 = vld [vmem:[%s914_s3] sm:$0xff]  ;;  %v719_v16 = vld [vmem:[#allocation2 + $0x38] sm:$0xff] }
  0x10   : > { %s623_s11 = sshll.u32 %s920_s10, 3  ;;  %v718_v18 = vld [vmem:[#allocation2 + $0x30] sm:$0xff]  ;;  %728 = vmatpush.bf16.msra.mxu2 %v719_v16  ;;  %v757_v19 = vld [vmem:[%s913_s2] ss:$0 sm:$0xff]  ;;  %v717_v20 = vld [vmem:[#allocation2 + $0x28] sm:$0xff] }
  0x11   : > { %s291_s14 = scalar_lea.vmem %s911_s0, %s623_s11  ;;  %340 = vmatpush.bf16.msra.mxu0 %v702_v1  ;;  %v716_v24 = vld [vmem:[#allocation2 + $0x20] sm:$0xff]  ;;  %v715_v35 = vld [vmem:[#allocation2 + $0x18] sm:$0xff]  ;;  %v714_v36 = vld [vmem:[#allocation2 + $0x10] sm:$0xff]  ;;  %s297_s23 = scalar_lea.vmem %s918_s7, %s623_s11 }
  0x12   : > { %v300_v2 = vld [vmem:[%s291_s14] sm:$0xff]  ;;  %v301_v3 = vld [vmem:[%s291_s14 + $0x8] sm:$0xff]  ;;  %427 = vmatpush.bf16.msra.mxu1 %v710_v5  ;;  %721 = vmatpush.bf16.msra.mxu3 %v710_v5  ;;  %v302_v9 = vld [vmem:[%s291_s14 + $0x10] sm:$0xff] }
  0x13   : > { %v304_v6 = vpack.c.bf16 %v301_v3, %v300_v2  ;;  %v303_v10 = vld [vmem:[%s291_s14 + $0x18] sm:$0xff]  ;;  %v713_v37 = vld [vmem:[#allocation2 + $0x8] sm:$0xff]  ;;  %v712_v38 = vld [vmem:[#allocation2] sm:$0xff] }
  0x14   : > { %v305_v11 = vpack.c.bf16 %v303_v10, %v302_v9  ;;  %729 = vmatpush.bf16.msra.mxu2 %v718_v18  ;;  %v758_v40 = vld [vmem:[%s915_s4] ss:$0 sm:$0xff] }
  0x15   : > { %634 = vmatmul.msk.bf16.vlgmr.msra.gmra.mxu0 %vm326_vm0, %v304_v6  ;;  %v759_v54 = vld [vmem:[%s917_s6] ss:$0 sm:$0xff] }
  0x16   : > { %428 = vmatpush.bf16.msra.mxu1 %v709_v7  ;;  %722 = vmatpush.bf16.msra.mxu3 %v709_v7 }
  0x17   : > { %515 = vmatpush.bf16.msrb.mxu0 %v719_v16 }
  0x18   : > { %730 = vmatpush.bf16.msra.mxu2 %v717_v20 }
  0x1a   : > { %429 = vmatpush.bf16.msra.mxu1 %v708_v8  ;;  %723 = vmatpush.bf16.msra.mxu3 %v708_v8 }
  0x1b   : > { %516 = vmatpush.bf16.msrb.mxu0 %v718_v18 }
  0x1c   : > { %731 = vmatpush.bf16.msra.mxu2 %v716_v24 }
  0x1e   : > { %430 = vmatpush.bf16.msra.mxu1 %v707_v12  ;;  %724 = vmatpush.bf16.msra.mxu3 %v707_v12 }
  0x1f   : > { %517 = vmatpush.bf16.msrb.mxu0 %v717_v20 }
  0x20   : > { %732 = vmatpush.bf16.msra.mxu2 %v715_v35 }
  0x22   : > { %431 = vmatpush.bf16.msra.mxu1 %v706_v13  ;;  %725 = vmatpush.bf16.msra.mxu3 %v706_v13 }
  0x23   : > { %518 = vmatpush.bf16.msrb.mxu0 %v716_v24 }
  0x24   : > { %733 = vmatpush.bf16.msra.mxu2 %v714_v36 }
  0x25   : > { %635 = vmatmul.msk.bf16.gmra.mxu0 %vm326_vm0, %v305_v11 }
  0x26   : > { %432 = vmatpush.bf16.msra.mxu1 %v705_v14  ;;  %726 = vmatpush.bf16.msra.mxu3 %v705_v14 }
  0x27   : > { %519 = vmatpush.bf16.msrb.mxu0 %v715_v35 }
  0x28   : > { %734 = vmatpush.bf16.msra.mxu2 %v713_v37 }
  0x2a   : > { %433 = vmatpush.bf16.msra.mxu1 %v704_v15  ;;  %727 = vmatpush.bf16.msra.mxu3 %v704_v15 }
  0x2b   : > { %520 = vmatpush.bf16.msrb.mxu0 %v714_v36 }
  0x2c   : > { %735 = vmatpush.bf16.msra.mxu2 %v712_v38 }
  0x2f   : > { %521 = vmatpush.bf16.msrb.mxu0 %v713_v37 }
  0x33   : > { %522 = vmatpush.bf16.msrb.mxu0 %v712_v38 }
  0x92   : > { %v342_v17 = vpop.f32.mrf.mxu0 }
  0x93   : > { %v343_v21 = vadd.f32 %v757_v19, %v342_v17 }
  0x95   : > { %v352_v25 = vmax.f32 %v343_v21, 0.0 }
  0x9a   : > { %v344_v22 = vpop.f32.mrf.mxu0 }
  0x9b   : > { %v345_v23 = vadd.f32 %v757_v19, %v344_v22 }
  0x9d   : > { %v353_v26 = vmax.f32 %v345_v23, 0.0 }
  0x9f   : > { %v356_v27 = vpack.c.bf16 %v353_v26, %v352_v25 }
  0xa1   : > { %434 = vmatmul.bf16.vlgmr.msra.gmra.mxu1 %v356_v27 }
  0xa2   : > { %v347_v28 = vpop.f32.mrf.mxu0 }
  0xa3   : > { %v348_v29 = vadd.f32 %v757_v19, %v347_v28 }
  0xa5   : > { %v354_v32 = vmax.f32 %v348_v29, 0.0 }
  0xaa   : > { %v349_v30 = vpop.f32.mrf.mxu0 }
  0xab   : > { %v350_v31 = vadd.f32 %v757_v19, %v349_v30 }
  0xad   : > { %v355_v33 = vmax.f32 %v350_v31, 0.0 }
  0xaf   : > { %v357_v34 = vpack.c.bf16 %v355_v33, %v354_v32 }
  0xb1   : > { %439 = vmatmul.bf16.vlgmr.msra.gmra.mxu3 %v357_v34 }
 0x11e   : > { %v435_v39 = vpop.f32.mrf.mxu1 }
 0x11f   : > { %v436_v41 = vadd.f32 %v758_v40, %v435_v39 }
 0x121   : > { %v445_v44 = vmax.f32 %v436_v41, 0.0 }
 0x126   : > { %v437_v42 = vpop.f32.mrf.mxu1 }
 0x127   : > { %v438_v43 = vadd.f32 %v758_v40, %v437_v42 }
 0x129   : > { %v446_v45 = vmax.f32 %v438_v43, 0.0 }
 0x12b   : > { %v449_v46 = vpack.c.bf16 %v446_v45, %v445_v44 }
 0x12d   : > { %523 = vmatmul.bf16.vlgmr.msrb.gmra.mxu0 %v449_v46 }
 0x134   : > { %v440_v47 = vpop.f32.mrf.mxu3 }
 0x135   : > { %v441_v48 = vadd.f32 %v758_v40, %v440_v47 }
 0x137   : > { %v447_v51 = vmax.f32 %v441_v48, 0.0 }
 0x13c   : > { %v442_v49 = vpop.f32.mrf.mxu3 }
 0x13d   : > { %v443_v50 = vadd.f32 %v758_v40, %v442_v49 }
 0x13f   : > { %v448_v52 = vmax.f32 %v443_v50, 0.0 }
 0x141   : > { %v450_v53 = vpack.c.bf16 %v448_v52, %v447_v51 }
 0x143   : > { %528 = vmatmul.bf16.vlgmr.msra.gmra.mxu2 %v450_v53 }
 0x1aa   : > { %v524_v55 = vpop.f32.mrf.mxu0 }
 0x1ab   : > { %v538_v56 = vadd.f32 %v759_v54, %v524_v55 }
 0x1ad   : > { %543 = vst.msk [vmem:[%s297_s23] sm:$0xff] %vm542_vm1, %v538_v56 }
 0x1b2   : > { %v526_v57 = vpop.f32.mrf.mxu0 }
 0x1b3   : > { %v539_v58 = vadd.f32 %v759_v54, %v526_v57 }
 0x1b5   : > { %544 = vst.msk [vmem:[%s297_s23 + $0x8] sm:$0xff] %vm542_vm1, %v539_v58 }
 0x1c6   : > { %v529_v59 = vpop.f32.mrf.mxu2 }
 0x1c7   : > { %v540_v60 = vadd.f32 %v759_v54, %v529_v59 }
 0x1c9   : > { %545 = vst.msk [vmem:[%s297_s23 + $0x10] sm:$0xff] %vm542_vm1, %v540_v60 }
 0x1ce   : > { %v531_v61 = vpop.f32.mrf.mxu2 }
 0x1cf   : > { %v541_v62 = vadd.f32 %v759_v54, %v531_v61 }
 0x1d1   : > { %546 = vst.msk [vmem:[%s297_s23 + $0x18] sm:$0xff] %vm542_vm1, %v541_v62 }
 0x1d2 PF: > { %s18_s24 = sadd.s32 1, %s800_s24  }
 0x1d3   : > { %p15_p7 = scmp.ge.s32.totalorder %s18_s24, 4  }
 0x1d5   :  { %17 = sbr.rel (!%p15_p7) target bundleno = 1 (0x1), region = 83 }
 0x1da   :  { %569 = vsyncpa [#allocation3], 1 }
 0x1db   :  { %571 = vsyncpa [#allocation3 + $0x1], 1 }

</bundles_post_ra>
